<compile_context>
chip_gen: v7x
topology: tpu7x:2x2x1
jax: 0.10.0
libtpu: 0.0.40
codegen_flags: <defaults>
</compile_context>

<pallas_src>
import math
import functools

import jax
import jax.numpy as jnp
from jax.experimental import pallas as pl
from jax.experimental.pallas import tpu as pltpu


def _round_up(x, m):
    return ((x + m - 1) // m) * m


# --------------------------------------------------------------------------- #
# Fused single-block kernel: whole problem resident in VMEM, grid = ().
# --------------------------------------------------------------------------- #
def _fused_kernel(h_ref, w_ref, b_ref, o_ref):
    acc = jnp.dot(h_ref[...], w_ref[...], preferred_element_type=jnp.float32)
    o_ref[...] = jnp.tanh(acc + b_ref[...]).astype(o_ref.dtype)


# --------------------------------------------------------------------------- #
# Tiled kernel for large shapes: K-reduction on grid axis 2, accumulate
# directly into the (resident) f32 output block — no scratch accumulator.
# --------------------------------------------------------------------------- #
def _tiled_kernel(h_ref, w_ref, b_ref, o_ref):
    k = pl.program_id(2)

    @pl.when(k == 0)
    def _():
        o_ref[...] = jnp.zeros_like(o_ref)

    o_ref[...] += jnp.dot(
        h_ref[...], w_ref[...], preferred_element_type=jnp.float32
    )

    @pl.when(k == pl.num_programs(2) - 1)
    def _():
        o_ref[...] = jnp.tanh(o_ref[...] + b_ref[...]).astype(o_ref.dtype)


# Keep the fused path well inside the scoped-VMEM default on every generation
# (v5e 16 MiB scoped, v6e/v7x 32 MiB scoped).
_FUSED_VMEM_BYTES = 8 * 1024 * 1024


@functools.partial(
    jax.jit, static_argnames=("tm", "tn", "tk", "force_tiled")
)
def lncrna_encoder_forward(h_t, w1, b1, *, tm=128, tn=128, tk=512,
                           force_tiled=False):
    """z1 = tanh(H_T @ W1 + b1) — forward of lncRNA_encoder."""
    M, K = h_t.shape
    K2, N = w1.shape
    assert K == K2 and b1.shape == (N,)

    h_t = h_t.astype(jnp.float32)
    w1 = w1.astype(jnp.float32)
    b1_2d = b1.reshape(1, N).astype(jnp.float32)

    footprint = 4 * (M * K + K * N + M * N + N)
    if footprint <= _FUSED_VMEM_BYTES and not force_tiled:
        # Single block, no grid, no scratch: o = tanh(H @ W + b) in one shot.
        # Pad to (sublane=8, lane=128) multiples so loads/stores are full
        # unmasked vregs; padding is tiny at these sizes and sliced off below.
        Mp = _round_up(M, 8)
        Kp = _round_up(K, 128)
        Np = _round_up(N, 128)
        h_p = h_t if (Mp == M and Kp == K) else jnp.pad(
            h_t, ((0, Mp - M), (0, Kp - K)))
        w_p = w1 if (Kp == K and Np == N) else jnp.pad(
            w1, ((0, Kp - K), (0, Np - N)))
        b_p = b1_2d if Np == N else jnp.pad(b1_2d, ((0, 0), (0, Np - N)))

        out_p = pl.pallas_call(
            _fused_kernel,
            out_shape=jax.ShapeDtypeStruct((Mp, Np), jnp.float32),
        )(h_p, w_p, b_p)
        return out_p if (Mp == M and Np == N) else out_p[:M, :N]

    # ---------------- tiled fallback for big shapes ---------------- #
    # Large K tile amortizes per-grid-step overhead; shrink it if K is small.
    tk_eff = tk if K >= tk else _round_up(K, 128)
    Mp = _round_up(M, tm)
    Np = _round_up(N, tn)
    Kp = _round_up(K, tk_eff)

    # Zero-pad to tile multiples (zeros contribute nothing to the reduction;
    # padded rows/cols are sliced away below).
    h_p = jnp.pad(h_t, ((0, Mp - M), (0, Kp - K)))
    w_p = jnp.pad(w1, ((0, Kp - K), (0, Np - N)))
    b_p = jnp.pad(b1_2d, ((0, 0), (0, Np - N)))

    grid = (Mp // tm, Np // tn, Kp // tk_eff)
    out_p = pl.pallas_call(
        _tiled_kernel,
        out_shape=jax.ShapeDtypeStruct((Mp, Np), jnp.float32),
        grid_spec=pltpu.PrefetchScalarGridSpec(
            num_scalar_prefetch=0,
            grid=grid,
            in_specs=[
                pl.BlockSpec((tm, tk_eff), lambda i, j, k: (i, k)),   # H_T tile
                pl.BlockSpec((tk_eff, tn), lambda i, j, k: (k, j)),   # W1 tile
                pl.BlockSpec((1, tn), lambda i, j, k: (0, j)),        # b1 tile
            ],
            out_specs=pl.BlockSpec((tm, tn), lambda i, j, k: (i, j)),
        ),
        compiler_params=pltpu.CompilerParams(
            dimension_semantics=("parallel", "parallel", "arbitrary")
        ),
    )(h_p, w_p, b_p)
    return out_p[:M, :N]


def xavier_uniform(key, shape, gain=1.414):
    """Matches nn.init.xavier_uniform_ for a 2-D weight."""
    fan_in, fan_out = shape[0], shape[1]
    a = gain * math.sqrt(6.0 / (fan_in + fan_out))
    return jax.random.uniform(key, shape, jnp.float32, minval=-a, maxval=a)


if __name__ == "__main__":
    key = jax.random.PRNGKey(0)
    k_h, k_w, k_h2, k_w2, k_b2 = jax.random.split(key, 5)

    # ---- reference-size problem (num_in_lncRNA=256, num_hidden=128, M=8) ----
    # Exercises the fused single-block path.
    num_in_lncRNA, num_hidden, M = 256, 128, 8
    H_T = jax.random.normal(k_h, (M, num_in_lncRNA), jnp.float32)
    W1 = xavier_uniform(k_w, (num_in_lncRNA, num_hidden), gain=1.414)
    b1 = jnp.zeros((num_hidden,), jnp.float32)  # module inits b1 to zeros

    out = lncrna_encoder_forward(H_T, W1, b1)
    jax.block_until_ready(out)
    ref = jnp.tanh(H_T @ W1 + b1)
    assert out.shape == ref.shape
    assert jnp.allclose(out, ref, atol=1e-4, rtol=1e-4), "fused path mismatch"

    # ---- uneven small shapes, forced through the tiled/padded path ----
    M2, K2, N2 = 50, 300, 70
    H2 = jax.random.normal(k_h2, (M2, K2), jnp.float32)
    W2 = xavier_uniform(k_w2, (K2, N2), gain=1.414)
    b2 = 0.1 * jax.random.normal(k_b2, (N2,), jnp.float32)

    out2 = lncrna_encoder_forward(H2, W2, b2, force_tiled=True)
    jax.block_until_ready(out2)
    ref2 = jnp.tanh(H2 @ W2 + b2)
    assert out2.shape == ref2.shape
    assert jnp.allclose(out2, ref2, atol=1e-4, rtol=1e-4), "tiled path mismatch"

    print("KERNEL_OK")
</pallas_src>

<mosaic_0001>
module attributes {stable_mosaic.version = 11 : i64} {
  func.func @_fused_kernel(%arg0: memref<8x256xf32, #tpu.memory_space<vmem>>, %arg1: memref<256x128xf32, #tpu.memory_space<vmem>>, %arg2: memref<1x128xf32, #tpu.memory_space<vmem>>, %arg3: memref<8x128xf32, #tpu.memory_space<vmem>>) attributes {dimension_semantics = [], scalar_prefetch = 0 : i64, scratch_operands = 0 : i64, tpu.core_type = #tpu.core_type<tc>} {
    %c0 = arith.constant 0 : index
    %c0_0 = arith.constant 0 : index
    %0 = vector.load %arg0[%c0, %c0_0] : memref<8x256xf32, #tpu.memory_space<vmem>>, vector<8x256xf32>
    %c0_1 = arith.constant 0 : index
    %c0_2 = arith.constant 0 : index
    %1 = vector.load %arg1[%c0_1, %c0_2] : memref<256x128xf32, #tpu.memory_space<vmem>>, vector<256x128xf32>
    %cst = arith.constant dense<0.000000e+00> : vector<8x128xf32>
    %2 = tpu.matmul %0, %1, %cst {dimension_numbers = #tpu.dot_dimension_numbers<[1], [0], [0], [1], [0, 0, 1, 1], [], []>} : vector<8x256xf32>, vector<256x128xf32>, vector<8x128xf32> -> vector<8x128xf32>
    %c0_3 = arith.constant 0 : index
    %c0_4 = arith.constant 0 : index
    %3 = vector.load %arg2[%c0_3, %c0_4] : memref<1x128xf32, #tpu.memory_space<vmem>>, vector<1x128xf32>
    %4 = vector.broadcast %3 : vector<1x128xf32> to vector<8x128xf32>
    %5 = arith.addf %2, %4 : vector<8x128xf32>
    %6 = math.tanh %5 : vector<8x128xf32>
    %c0_5 = arith.constant 0 : index
    %c0_6 = arith.constant 0 : index
    %7 = vector.load %arg3[%c0_5, %c0_6] : memref<8x128xf32, #tpu.memory_space<vmem>>, vector<8x128xf32>
    tpu.vector_store %arg3[%c0_5, %c0_6], %6 {strides = array<i32>} : memref<8x128xf32, #tpu.memory_space<vmem>>, vector<8x128xf32>,
    return
  }
}

</mosaic_0001>

<bundles_post_ra>
// kernel: lncrna_encoder_forward.1
= control target key start
LH: loop header
LB: loop body
LE: loop exit
PB: predicated region body
PF: predicated region fallthrough
CT: control target
= control target key end

     0   :  { %8 = vsyncpa [#allocation3], 0  ;;  %s388_s0 = inlined_call_operand.hbm [shape: f32[8,256], index: 0, kind: input, shape index: {}]   ;;  %s389_s1 = inlined_call_operand.hbm [shape: f32[256,128], index: 1, kind: input, shape index: {}]   ;;  %s390_s2 = inlined_call_operand.vmem [shape: f32[1,128], index: 2, kind: input, shape index: {}]   ;;  %s391_s3 = inlined_call_operand.hbm [shape: f32[8,128], index: 3, kind: output, shape index: {}]  }
   0x1   :  { %9 = vsyncpa [#allocation6], 0 }
   0x2   :  { %10 = vsyncpa [#allocation4], 0  ;;  %s317_s12 = smov [#allocation2]   ;;  %s318_s14 = smov [#allocation5]  }
   0x3   :  { %s17_s13 = sshll.u32 %s317_s12, 4  ;;  %s26_s15 = sshll.u32 %s318_s14, 4  ;;  %s18_s13 = int_to_ptr.vmem [resolvable:$true] %s17_s13  ;;  %s342_s15 = int_to_ptr.vmem [resolvable:$true] %s26_s15 }
   0x4   :  { %s245_s18 = scalar_lea.hbm %s388_s0, 256 }
   0x5   :  { %p246_p0 = scmp.ne.s32.totalorder %s388_s0, %s245_s18  ;;  %p249_p1 = scmp.lt.u32.totalorder %s245_s18, %s388_s0 }
   0x7   :  { %p251_p2 = pnand %p249_p1, %p246_p0 }
   0x9   :  { %254 = shalt.err (!%p251_p2)
}
   0xa   :  { %s255_s23 = scalar_lea.vmem %s18_s13, 256  ;;  %p260_p4 = scmp.lt.s32.totalorder %s18_s13, %s18_s13 }
   0xb   :  { %p256_p3 = scmp.ne.s32.totalorder %s18_s13, %s255_s23  ;;  %p261_p5 = scmp.lt.s32.totalorder %s255_s23, %s255_s23 }
   0xd   :  { %p262_p6 = por %p261_p5, %p260_p4 }
   0xf   :  { %p263_p7 = pnand %p262_p6, %p256_p3 }
  0x11   :  { %266 = shalt.err (!%p263_p7)
}
  0x12   :  { %20 = dma.hbm_to_vmem [thread:$0]  %s388_s0, 256, %s18_s13, [#allocation3]  }
  0x13   :  { %s267_s28 = scalar_lea.hbm %s389_s1, 4096 }
  0x14   :  { %p268_p8 = scmp.ne.s32.totalorder %s389_s1, %s267_s28  ;;  %p271_p9 = scmp.lt.u32.totalorder %s267_s28, %s389_s1 }
  0x16   :  { %p273_p10 = pnand %p271_p9, %p268_p8 }
  0x18   :  { %276 = shalt.err (!%p273_p10)
}
  0x19   :  { %s277_s6 = scalar_lea.vmem %s342_s15, 4096  ;;  %p282_p12 = scmp.lt.s32.totalorder %s342_s15, %s342_s15 }
  0x1a   :  { %p278_p11 = scmp.ne.s32.totalorder %s342_s15, %s277_s6  ;;  %p283_p13 = scmp.lt.s32.totalorder %s277_s6, %s277_s6 }
  0x1c   :  { %p284_p0 = por %p283_p13, %p282_p12 }
  0x1e   :  { %p285_p1 = pnand %p284_p0, %p278_p11 }
  0x20   :  { %288 = shalt.err (!%p285_p1)
}
  0x21   :  { %s319_s0 = smov 128   ;;  %s320_s7 = smov 8  }
  0x22   :  { %32 = dma.hbm_to_vmem [thread:$0]  %s389_s1, 4096, %s342_s15, [#allocation6], %s319_s0, %s319_s0, %s320_s7  }
  0x23   :  { %311 = dma.done.wait [#allocation3], 256  }
  0x24   :  { %312 = vsyncadd [#allocation3], 4294967040 }
  0x25   :  { %313 = dma.done.wait [#allocation6], 4096  }
  0x26   :  { %314 = vsyncadd [#allocation6], 4294963200  ;;  %v59_v0 = vld [vmem:[#allocation5 + $0x80] sm:$0xff]  ;;  %v60_v1 = vld [vmem:[#allocation5 + $0x88] sm:$0xff]  ;;  %s321_s11 = smov [#allocation7]  }
  0x27   :  { %v43_v2 = vld [vmem:[#allocation5] sm:$0xff]  ;;  %v206_v3 = vpack.c.bf16 %v60_v1, %v59_v0  ;;  %v44_v4 = vld [vmem:[#allocation5 + $0x8] sm:$0xff]  ;;  %v61_v5 = vld [vmem:[#allocation5 + $0x90] sm:$0xff]  ;;  %s160_s12 = sshll.u32 %s321_s11, 4  ;;  %s161_s12 = int_to_ptr.vmem [resolvable:$true] %s160_s12 }
  0x28   :  { %v62_v6 = vld [vmem:[#allocation5 + $0x98] sm:$0xff]  ;;  %v208_v7 = vpack.c.bf16 %v44_v4, %v43_v2  ;;  %v45_v9 = vld [vmem:[#allocation5 + $0x10] sm:$0xff]  ;;  %v63_v11 = vld [vmem:[#allocation5 + $0xa0] sm:$0xff]  ;;  %s289_s13 = scalar_lea.vmem %s161_s12, 128  ;;  %p294_p3 = scmp.lt.s32.totalorder %s161_s12, %s161_s12 }
  0x29   :  { %v210_v8 = vpack.c.bf16 %v62_v6, %v61_v5  ;;  %v46_v10 = vld [vmem:[#allocation5 + $0x18] sm:$0xff]  ;;  %207 = vmatprep.subr.bf16.mxu0 %v206_v3  ;;  %v64_v12 = vld [vmem:[#allocation5 + $0xa8] sm:$0xff]  ;;  %v47_v15 = vld [vmem:[#allocation5 + $0x20] sm:$0xff]  ;;  %p290_p2 = scmp.ne.s32.totalorder %s161_s12, %s289_s13  ;;  %p295_p4 = scmp.lt.s32.totalorder %s289_s13, %s289_s13 }
  0x2a   :  { %209 = vmatpush3.bf16.msra.mxu0 %v208_v7  ;;  %v212_v13 = vpack.c.bf16 %v46_v10, %v45_v9  ;;  %v214_v14 = vpack.c.bf16 %v64_v12, %v63_v11  ;;  %v48_v16 = vld [vmem:[#allocation5 + $0x28] sm:$0xff]  ;;  %v65_v17 = vld [vmem:[#allocation5 + $0xb0] sm:$0xff]  ;;  %v66_v18 = vld [vmem:[#allocation5 + $0xb8] sm:$0xff] }
  0x2b   :  { %211 = vmatprep.subr.bf16.mxu0 %v210_v8  ;;  %v216_v19 = vpack.c.bf16 %v48_v16, %v47_v15  ;;  %v218_v20 = vpack.c.bf16 %v66_v18, %v65_v17  ;;  %v49_v21 = vld [vmem:[#allocation5 + $0x30] sm:$0xff]  ;;  %v50_v22 = vld [vmem:[#allocation5 + $0x38] sm:$0xff]  ;;  %v67_v23 = vld [vmem:[#allocation5 + $0xc0] sm:$0xff]  ;;  %p296_p5 = por %p295_p4, %p294_p3 }
  0x2c   :  { %v68_v24 = vld [vmem:[#allocation5 + $0xc8] sm:$0xff]  ;;  %v42_v25 = vld [vmem:[#allocation2 + $0x8] sm:$0xff]  ;;  %v220_v26 = vpack.c.bf16 %v50_v22, %v49_v21  ;;  %v51_v28 = vld [vmem:[#allocation5 + $0x40] sm:$0xff] }
  0x2d   :  { %146 = vmatprep.mubr.f32.mxu0 %v42_v25  ;;  %v222_v27 = vpack.c.bf16 %v68_v24, %v67_v23  ;;  %v52_v29 = vld [vmem:[#allocation5 + $0x48] sm:$0xff]  ;;  %v69_v30 = vld [vmem:[#allocation5 + $0xd0] sm:$0xff]  ;;  %v70_v31 = vld [vmem:[#allocation5 + $0xd8] sm:$0xff]  ;;  %p297_p6 = pnand %p296_p5, %p290_p2 }
  0x2e   :  { %213 = vmatpush3.bf16.msra.mxu0 %v212_v13  ;;  %v224_v32 = vpack.c.bf16 %v52_v29, %v51_v28  ;;  %v226_v33 = vpack.c.bf16 %v70_v31, %v69_v30  ;;  %v53_v34 = vld [vmem:[#allocation5 + $0x50] sm:$0xff]  ;;  %v54_v35 = vld [vmem:[#allocation5 + $0x58] sm:$0xff]  ;;  %v71_v36 = vld [vmem:[#allocation5 + $0xe0] sm:$0xff] }
  0x2f   :  { %215 = vmatprep.subr.bf16.mxu0 %v214_v14  ;;  %v72_v37 = vld [vmem:[#allocation5 + $0xe8] sm:$0xff]  ;;  %v228_v38 = vpack.c.bf16 %v54_v35, %v53_v34  ;;  %v55_v40 = vld [vmem:[#allocation5 + $0x60] sm:$0xff]  ;;  %v73_v42 = vld [vmem:[#allocation5 + $0xf0] sm:$0xff] }
  0x30   :  { %v230_v39 = vpack.c.bf16 %v72_v37, %v71_v36  ;;  %v56_v41 = vld [vmem:[#allocation5 + $0x68] sm:$0xff]  ;;  %v74_v43 = vld [vmem:[#allocation5 + $0xf8] sm:$0xff]  ;;  %v57_v46 = vld [vmem:[#allocation5 + $0x70] sm:$0xff] }
  0x31   :  { %v232_v44 = vpack.c.bf16 %v56_v41, %v55_v40  ;;  %v234_v45 = vpack.c.bf16 %v74_v43, %v73_v42  ;;  %v58_v47 = vld [vmem:[#allocation5 + $0x78] sm:$0xff]  ;;  %v41_v49 = vld [vmem:[#allocation2] sm:$0xff] }
  0x32   :  { %217 = vmatpush3.bf16.msra.mxu0 %v216_v19  ;;  %v236_v48 = vpack.c.bf16 %v58_v47, %v57_v46  ;;  %v170_v51 = vld [vmem:[%s390_s2] ss:$0 sm:$0xff] }
  0x33   :  { %219 = vmatprep.subr.bf16.mxu0 %v218_v20 }
  0x36   :  { %221 = vmatpush3.bf16.msra.mxu0 %v220_v26 }
  0x37   :  { %223 = vmatprep.subr.bf16.mxu0 %v222_v27 }
  0x3a   :  { %225 = vmatpush3.bf16.msra.mxu0 %v224_v32 }
  0x3b   :  { %227 = vmatprep.subr.bf16.mxu0 %v226_v33 }
  0x3e   :  { %229 = vmatpush3.bf16.msra.mxu0 %v228_v38 }
  0x3f   :  { %231 = vmatprep.subr.bf16.mxu0 %v230_v39 }
  0x42   :  { %233 = vmatpush3.bf16.msra.mxu0 %v232_v44 }
  0x43   :  { %235 = vmatprep.subr.bf16.mxu0 %v234_v45 }
  0x46   :  { %237 = vmatpush3.bf16.msra.mxu0 %v236_v48 }
  0x49   :  { %147 = vmatmul.mubr.f32.vlgmr.msra.gmra.mrb[0].mxu0 %v41_v49 }
 0x11c   :  { %v203_v50 = vpop.f32.mrb[0].mxu0 }
 0x11d   :  { %v204_v52 = vpop.f32.mrb[1].mxu0 }
 0x11e   :  { %v205_v53 = vadd.f32 %v204_v52, %v203_v50 }
 0x120   :  { %v149_v54 = vadd.f32 %v205_v53, %v170_v51 }
 0x122   :  { %243 = vtanh.f32 %v149_v54 }
 0x12c   :  { %v244_v55 = vpop.eup %243 }
 0x12d   :  { %153 = vst [vmem:[#allocation7] sm:$0xff] %v244_v55 }
 0x12e   :  { %300 = shalt.err (!%p297_p6)
}
 0x12f   :  { %s301_s2 = scalar_lea.hbm %s391_s3, 128 }
 0x130   :  { %p302_p7 = scmp.ne.s32.totalorder %s391_s3, %s301_s2  ;;  %p305_p8 = scmp.lt.u32.totalorder %s301_s2, %s391_s3 }
 0x132   :  { %p307_p9 = pnand %p305_p8, %p302_p7 }
 0x134   :  { %310 = shalt.err (!%p307_p9)
}
 0x135   :  { %163 = dma.vmem_to_hbm [thread:$0]  %s161_s12, 128, %s391_s3, [#allocation4]  }
 0x136   :  { %315 = dma.done.wait [#allocation4], 128  }
 0x137   :  { %316 = vsyncadd [#allocation4], 4294967168 }
 0x138   :  { %167 = vsyncpa [#allocation3], 1 }
 0x139   :  { %168 = vsyncpa [#allocation6], 1 }
 0x13a   :  { %169 = vsyncpa [#allocation4], 1 }

</bundles_post_ra>
